<compile_context>
chip_gen: v6e
topology: v6e:2x2x1
jax: 0.10.0
libtpu: 0.0.40
codegen_flags: <defaults>
</compile_context>

<pallas_src>
import functools

import jax
import jax.numpy as jnp
from jax.experimental import pallas as pl
from jax.experimental.pallas import tpu as pltpu

LN_EPS = 1e-5  # PyTorch nn.LayerNorm default


def _gelu(x):
    # TODO(synk): PyTorch nn.GELU default is exact erf GELU; tanh approximation
    # is used (max deviation ~1e-3) since erf has no guaranteed Mosaic lowering.
    return jax.nn.gelu(x, approximate=True)


def _layernorm(x, w, b):
    mu = jnp.mean(x, axis=-1, keepdims=True)
    var = jnp.mean((x - mu) ** 2, axis=-1, keepdims=True)
    return (x - mu) * jax.lax.rsqrt(var + LN_EPS) * w + b


def _pick_row_tile(n, target=512):
    """Largest row-tile <= target that divides n and is a multiple of 8."""
    if n <= target or n % 8 != 0:
        return n
    t = min(target, n)
    t -= t % 8
    for cand in range(t, 7, -8):
        if n % cand == 0:
            return cand
    return n


# ----------------------------------------------------------------------------
# Kernels
# ----------------------------------------------------------------------------
def _pos_conv_kernel(xpad_ref, w_ref, b_ref, out_ref, *, T, K, pad):
    """Conv1d taps (dense per-tap matmuls) + GELU + residual. One batch / step.

    xpad: (1, T + 2*pad, D) f32, w: (K, D_in, D_out) bf16, b: (1, D) f32,
    out:  (1, T, D) f32.  Producing only the first T outputs reproduces
    SamePad(K) (drop last output when K is even).
    """
    D = out_ref.shape[-1]
    acc = jnp.zeros((T, D), jnp.float32)
    for k in range(K):
        xk = xpad_ref[0, k:k + T, :].astype(jnp.bfloat16)
        acc = acc + jnp.dot(xk, w_ref[k], preferred_element_type=jnp.float32)
    conv = _gelu(acc + b_ref[...])
    res = xpad_ref[0, pad:pad + T, :].astype(jnp.float32)
    out_ref[0] = (res + conv).astype(out_ref.dtype)


def _ln_qkv_kernel(x_ref, lnw_ref, lnb_ref, wqkv_ref, bqkv_ref,
                   q_ref, k_ref, v_ref, *, scale):
    """Pre-attention LayerNorm + fused Q/K/V projection on one row tile.

    x: (TILE_M, D) f32; wqkv: (D, 3D) bf16 resident (single MXU matmul);
    q/k/v out (TILE_M, D) bf16.  q is scaled by head_dim**-0.5 after bias
    (fairseq / WavLM convention).
    """
    D = q_ref.shape[-1]
    x = x_ref[...].astype(jnp.float32)
    xn = _layernorm(x, lnw_ref[...], lnb_ref[...])
    xb = xn.astype(jnp.bfloat16)
    qkv = jnp.dot(xb, wqkv_ref[...],
                  preferred_element_type=jnp.float32) + bqkv_ref[...]
    q_ref[...] = (qkv[:, :D] * scale).astype(q_ref.dtype)
    k_ref[...] = qkv[:, D:2 * D].astype(k_ref.dtype)
    v_ref[...] = qkv[:, 2 * D:].astype(v_ref.dtype)


def _attn_kernel(q_ref, k_ref, v_ref, ctx_ref, p_ref, *, H):
    """All-heads attention for one batch element.

    q/k/v: (1, T, D) bf16 (q pre-scaled).  Outputs:
      ctx:  (1, T, D) bf16 — heads concatenated (single lane-dense store),
      p:    (1, T, T) f32  — attention probabilities averaged over heads
                             (fused head-mean; no per-head HBM writeback).
    """
    T = q_ref.shape[1]
    D = q_ref.shape[2]
    Dh = D // H
    q = q_ref[0]                              # (T, D) bf16
    k = k_ref[0]
    v = v_ref[0]

    ctx_parts = []
    p_acc = jnp.zeros((T, T), jnp.float32)
    for h in range(H):
        qh = q[:, h * Dh:(h + 1) * Dh]
        kh = k[:, h * Dh:(h + 1) * Dh]
        vh = v[:, h * Dh:(h + 1) * Dh]
        s = jax.lax.dot_general(qh, kh, (((1,), (1,)), ((), ())),
                                preferred_element_type=jnp.float32)   # (T, T)
        s = s - jnp.max(s, axis=-1, keepdims=True)
        e = jnp.exp(s)
        p = e * pl.reciprocal(jnp.sum(e, axis=-1, keepdims=True), approx=True)
        p_acc = p_acc + p
        ctx_parts.append(
            jnp.dot(p.astype(jnp.bfloat16), vh, preferred_element_type=jnp.float32))

    ctx = jnp.concatenate(ctx_parts, axis=-1)                          # (T, D)
    ctx_ref[0] = ctx.astype(ctx_ref.dtype)
    p_ref[0] = (p_acc * (1.0 / H)).astype(p_ref.dtype)


def _out_ffn_kernel(ctx_ref, res_ref, wo_ref, bo_ref, ln2w_ref, ln2b_ref,
                    w1_ref, b1_ref, w2_ref, b2_ref, out_ref):
    """Attention out-proj + residual, then pre-LN FFN (GELU) + residual.

    ctx: (TILE_M, D) bf16, res: (TILE_M, D) f32, weights bf16 resident.
    """
    ctx = ctx_ref[...]                                        # bf16
    res = res_ref[...].astype(jnp.float32)
    x = res + jnp.dot(ctx, wo_ref[...],
                      preferred_element_type=jnp.float32) + bo_ref[...]
    xn = _layernorm(x, ln2w_ref[...], ln2b_ref[...])
    h = _gelu(jnp.dot(xn.astype(jnp.bfloat16), w1_ref[...],
                      preferred_element_type=jnp.float32) + b1_ref[...])
    y = x + jnp.dot(h.astype(jnp.bfloat16), w2_ref[...],
                    preferred_element_type=jnp.float32) + b2_ref[...]
    out_ref[...] = y.astype(out_ref.dtype)


# ----------------------------------------------------------------------------
# Wrappers
# ----------------------------------------------------------------------------
_PAR1 = pltpu.CompilerParams(dimension_semantics=("parallel",))


def _const_spec(shape):
    nd = len(shape)
    return pl.BlockSpec(shape, lambda i, _nd=nd: (0,) * _nd)


def pos_conv_add(x, conv_w_taps, conv_b, K):
    B, T, D = x.shape
    pad = K // 2
    xpad = jnp.pad(x, ((0, 0), (pad, pad), (0, 0)))
    Tp = T + 2 * pad
    kernel = functools.partial(_pos_conv_kernel, T=T, K=K, pad=pad)
    return pl.pallas_call(
        kernel,
        grid=(B,),
        out_shape=jax.ShapeDtypeStruct((B, T, D), x.dtype),
        in_specs=[pl.BlockSpec((1, Tp, D), lambda b: (b, 0, 0)),
                  _const_spec((K, D, D)),
                  _const_spec((1, D))],
        out_specs=pl.BlockSpec((1, T, D), lambda b: (b, 0, 0)),
        compiler_params=_PAR1,
    )(xpad, conv_w_taps, conv_b.reshape(1, D))


def encoder_layer(x, lp, num_heads):
    B, T, D = x.shape
    H = num_heads
    Dh = D // H
    F = lp['w1'].shape[1]
    M = B * T
    x2d = x.reshape(M, D)

    tile_m = _pick_row_tile(M)
    row_spec = pl.BlockSpec((tile_m, D), lambda i: (i, 0))

    # --- LayerNorm1 + fused Q/K/V projection (row-tiled, weights resident) ---
    q, k, v = pl.pallas_call(
        functools.partial(_ln_qkv_kernel, scale=Dh ** -0.5),
        grid=(M // tile_m,),
        out_shape=(jax.ShapeDtypeStruct((M, D), jnp.bfloat16),) * 3,
        in_specs=[row_spec,
                  _const_spec((1, D)), _const_spec((1, D)),
                  _const_spec((D, 3 * D)), _const_spec((1, 3 * D))],
        out_specs=(row_spec,) * 3,
        compiler_params=_PAR1,
    )(x2d, lp['ln1_w'], lp['ln1_b'], lp['wqkv'], lp['bqkv'])

    # (M, D) -> (B, T, D) is a free metadata reshape (no transpose / HBM pass).
    q3, k3, v3 = q.reshape(B, T, D), k.reshape(B, T, D), v.reshape(B, T, D)

    # --- Attention: one grid step per batch, all heads fused in-kernel -------
    btd_spec = pl.BlockSpec((1, T, D), lambda b: (b, 0, 0))
    ptt_spec = pl.BlockSpec((1, T, T), lambda b: (b, 0, 0))
    ctx, attn_weights = pl.pallas_call(
        functools.partial(_attn_kernel, H=H),
        grid=(B,),
        out_shape=(jax.ShapeDtypeStruct((B, T, D), jnp.bfloat16),
                   jax.ShapeDtypeStruct((B, T, T), jnp.float32)),
        in_specs=[btd_spec, btd_spec, btd_spec],
        out_specs=(btd_spec, ptt_spec),
        compiler_params=_PAR1,
    )(q3, k3, v3)

    ctx2d = ctx.reshape(M, D)

    # --- Out-proj + residual + LayerNorm2 + FFN + residual (row-tiled) -------
    xnew = pl.pallas_call(
        _out_ffn_kernel,
        grid=(M // tile_m,),
        out_shape=jax.ShapeDtypeStruct((M, D), x.dtype),
        in_specs=[row_spec, row_spec,
                  _const_spec((D, D)), _const_spec((1, D)),
                  _const_spec((1, D)), _const_spec((1, D)),
                  _const_spec((D, F)), _const_spec((1, F)),
                  _const_spec((F, D)), _const_spec((1, D))],
        out_specs=row_spec,
        compiler_params=_PAR1,
    )(ctx2d, x2d, lp['wo'], lp['bo'], lp['ln2_w'], lp['ln2_b'],
      lp['w1'], lp['b1'], lp['w2'], lp['b2'])

    return xnew.reshape(B, T, D), attn_weights


def transformer_encoder_forward(x, params, padding_mask=None, tgt_layer=None):
    # TODO(synk): padding_mask handling, relative position bias, and the
    # student_pretraining branch (host-side torch.randperm span masking:
    # get_random_mask / get_rms_mask / expand_mask) are not implemented; only
    # the padding_mask=None inference path is covered. Dropout is identity.
    assert padding_mask is None
    x = pos_conv_add(x, params['conv_w_taps'], params['conv_b'], params['conv_k'])
    layer_results = [(x, None)]
    for i, lp in enumerate(params['layers']):
        x, attn_w = encoder_layer(x, lp, params['num_heads'])
        layer_results.append((x, attn_w))
        if tgt_layer is not None and i == tgt_layer:
            break
    return x, layer_results


# ----------------------------------------------------------------------------
# Deterministic parameter init (shapes from TransformerEncoder.__init__)
# ----------------------------------------------------------------------------
def init_params(key, D, H, F, L, conv_k, conv_groups):
    keys = jax.random.split(key, 4 * L * 6 + 8)
    ki = iter(keys)

    def lin(shape, std=0.02):   # init_bert_params: Linear ~ N(0, 0.02), bias = 0
        return jax.random.normal(next(ki), shape, jnp.float32) * std

    # make_conv_pos: grouped Conv1d(D, D, K, groups=g); init std = sqrt(4/(K*D)).
    conv_std = (4.0 / (conv_k * D)) ** 0.5
    Dg = D // conv_groups
    conv_w = lin((D, Dg, conv_k), std=conv_std)          # (out, in/groups, K)
    conv_b = jnp.zeros((D,), jnp.float32)
    # Expand grouped weight to dense block-diagonal, arranged as (K, D_in, D_out).
    dense = jnp.zeros((D, D, conv_k), jnp.float32)
    for g in range(conv_groups):
        dense = dense.at[g * Dg:(g + 1) * Dg, g * Dg:(g + 1) * Dg, :].set(
            conv_w[g * Dg:(g + 1) * Dg])
    conv_w_taps = jnp.transpose(dense, (2, 1, 0)).astype(jnp.bfloat16)

    bf = jnp.bfloat16
    layers = []
    for _ in range(L):
        wq = lin((D, D)).T
        wk = lin((D, D)).T
        wv = lin((D, D)).T
        lp = dict(
            ln1_w=jnp.ones((1, D), jnp.float32), ln1_b=jnp.zeros((1, D), jnp.float32),
            # Fused QKV weight (D, 3D) bf16; biases are zero at init.
            wqkv=jnp.concatenate([wq, wk, wv], axis=1).astype(bf),
            bqkv=jnp.zeros((1, 3 * D), jnp.float32),
            wo=lin((D, D)).T.astype(bf), bo=jnp.zeros((1, D), jnp.float32),
            ln2_w=jnp.ones((1, D), jnp.float32), ln2_b=jnp.zeros((1, D), jnp.float32),
            w1=lin((F, D)).T.astype(bf), b1=jnp.zeros((1, F), jnp.float32),
            w2=lin((D, F)).T.astype(bf), b2=jnp.zeros((1, D), jnp.float32),
        )
        layers.append(lp)

    return dict(conv_w_taps=conv_w_taps, conv_b=conv_b, layers=layers,
                conv_k=conv_k, num_heads=H)


if __name__ == "__main__":
    # Small config: encoder_embed_dim=32, num_heads=4, ffn_embed_dim=64,
    # encoder_layers=2, conv_pos=4, conv_pos_groups=4; input x: (B=2, T=8, D=32).
    key = jax.random.PRNGKey(0)
    B, T, D, H, F, L = 2, 8, 32, 4, 64, 2
    pkey, xkey = jax.random.split(key)
    params = init_params(pkey, D, H, F, L, conv_k=4, conv_groups=4)
    x = jax.random.normal(xkey, (B, T, D), jnp.float32)

    out, layer_results = transformer_encoder_forward(x, params)

    jax.block_until_ready(out)
    for xi, aw in layer_results:
        jax.block_until_ready(xi)
        if aw is not None:
            jax.block_until_ready(aw)
    print("KERNEL_OK")
</pallas_src>

<mosaic_0001>
module attributes {stable_mosaic.version = 11 : i64} {
  func.func @_pos_conv_kernel(%arg0: i32, %arg1: memref<1x12x32xf32, #tpu.memory_space<vmem>>, %arg2: memref<4x32x32xbf16, #tpu.memory_space<vmem>>, %arg3: memref<1x32xf32, #tpu.memory_space<vmem>>, %arg4: memref<1x8x32xf32, #tpu.memory_space<vmem>>) attributes {dimension_semantics = [#tpu.dimension_semantics<parallel>], iteration_bounds = array<i64: 2>, scalar_prefetch = 0 : i64, scratch_operands = 0 : i64, tpu.core_type = #tpu.core_type<tc>, window_params = [{transform_indices = @transform_0, window_bounds = array<i64: 1, 12, 32>}, {pipeline_mode = #tpu.pipeline_mode<synchronous>, transform_indices = @transform_1, window_bounds = array<i64: 4, 32, 32>}, {pipeline_mode = #tpu.pipeline_mode<synchronous>, transform_indices = @transform_2, window_bounds = array<i64: 1, 32>}, {transform_indices = @transform_3, window_bounds = array<i64: 1, 8, 32>}]} {
    %cst = arith.constant 0.000000e+00 : f32
    %0 = vector.broadcast %cst : f32 to vector<8x32xf32>
    %c0 = arith.constant 0 : index
    %c0_0 = arith.constant 0 : index
    %c0_1 = arith.constant 0 : index
    %1 = vector.load %arg1[%c0, %c0_0, %c0_1] : memref<1x12x32xf32, #tpu.memory_space<vmem>>, vector<1x8x32xf32>
    %2 = vector.shape_cast %1 : vector<1x8x32xf32> to vector<8x32xf32>
    %3 = arith.truncf %2 : vector<8x32xf32> to vector<8x32xbf16>
    %c0_2 = arith.constant 0 : index
    %c0_3 = arith.constant 0 : index
    %c0_4 = arith.constant 0 : index
    %4 = vector.load %arg2[%c0_2, %c0_3, %c0_4] : memref<4x32x32xbf16, #tpu.memory_space<vmem>>, vector<1x32x32xbf16>
    %5 = vector.shape_cast %4 : vector<1x32x32xbf16> to vector<32x32xbf16>
    %cst_5 = arith.constant dense<0.000000e+00> : vector<8x32xf32>
    %6 = tpu.matmul %3, %5, %cst_5 {dimension_numbers = #tpu.dot_dimension_numbers<[1], [0], [0], [1], [0, 0, 1, 1], [], []>} : vector<8x32xbf16>, vector<32x32xbf16>, vector<8x32xf32> -> vector<8x32xf32>
    %7 = arith.addf %0, %6 : vector<8x32xf32>
    %c0_6 = arith.constant 0 : index
    %c1 = arith.constant 1 : index
    %c0_7 = arith.constant 0 : index
    %8 = vector.load %arg1[%c0_6, %c1, %c0_7] : memref<1x12x32xf32, #tpu.memory_space<vmem>>, vector<1x8x32xf32>
    %9 = vector.shape_cast %8 : vector<1x8x32xf32> to vector<8x32xf32>
    %10 = arith.truncf %9 : vector<8x32xf32> to vector<8x32xbf16>
    %c1_8 = arith.constant 1 : index
    %c0_9 = arith.constant 0 : index
    %c0_10 = arith.constant 0 : index
    %11 = vector.load %arg2[%c1_8, %c0_9, %c0_10] : memref<4x32x32xbf16, #tpu.memory_space<vmem>>, vector<1x32x32xbf16>
    %12 = vector.shape_cast %11 : vector<1x32x32xbf16> to vector<32x32xbf16>
    %cst_11 = arith.constant dense<0.000000e+00> : vector<8x32xf32>
    %13 = tpu.matmul %10, %12, %cst_11 {dimension_numbers = #tpu.dot_dimension_numbers<[1], [0], [0], [1], [0, 0, 1, 1], [], []>} : vector<8x32xbf16>, vector<32x32xbf16>, vector<8x32xf32> -> vector<8x32xf32>
    %14 = arith.addf %7, %13 : vector<8x32xf32>
    %c0_12 = arith.constant 0 : index
    %c2 = arith.constant 2 : index
    %c0_13 = arith.constant 0 : index
    %15 = vector.load %arg1[%c0_12, %c2, %c0_13] : memref<1x12x32xf32, #tpu.memory_space<vmem>>, vector<1x8x32xf32>
    %16 = vector.shape_cast %15 : vector<1x8x32xf32> to vector<8x32xf32>
    %17 = arith.truncf %16 : vector<8x32xf32> to vector<8x32xbf16>
    %c2_14 = arith.constant 2 : index
    %c0_15 = arith.constant 0 : index
    %c0_16 = arith.constant 0 : index
    %18 = vector.load %arg2[%c2_14, %c0_15, %c0_16] : memref<4x32x32xbf16, #tpu.memory_space<vmem>>, vector<1x32x32xbf16>
    %19 = vector.shape_cast %18 : vector<1x32x32xbf16> to vector<32x32xbf16>
    %cst_17 = arith.constant dense<0.000000e+00> : vector<8x32xf32>
    %20 = tpu.matmul %17, %19, %cst_17 {dimension_numbers = #tpu.dot_dimension_numbers<[1], [0], [0], [1], [0, 0, 1, 1], [], []>} : vector<8x32xbf16>, vector<32x32xbf16>, vector<8x32xf32> -> vector<8x32xf32>
    %21 = arith.addf %14, %20 : vector<8x32xf32>
    %c0_18 = arith.constant 0 : index
    %c3 = arith.constant 3 : index
    %c0_19 = arith.constant 0 : index
    %22 = vector.load %arg1[%c0_18, %c3, %c0_19] : memref<1x12x32xf32, #tpu.memory_space<vmem>>, vector<1x8x32xf32>
    %23 = vector.shape_cast %22 : vector<1x8x32xf32> to vector<8x32xf32>
    %24 = arith.truncf %23 : vector<8x32xf32> to vector<8x32xbf16>
    %c3_20 = arith.constant 3 : index
    %c0_21 = arith.constant 0 : index
    %c0_22 = arith.constant 0 : index
    %25 = vector.load %arg2[%c3_20, %c0_21, %c0_22] : memref<4x32x32xbf16, #tpu.memory_space<vmem>>, vector<1x32x32xbf16>
    %26 = vector.shape_cast %25 : vector<1x32x32xbf16> to vector<32x32xbf16>
    %cst_23 = arith.constant dense<0.000000e+00> : vector<8x32xf32>
    %27 = tpu.matmul %24, %26, %cst_23 {dimension_numbers = #tpu.dot_dimension_numbers<[1], [0], [0], [1], [0, 0, 1, 1], [], []>} : vector<8x32xbf16>, vector<32x32xbf16>, vector<8x32xf32> -> vector<8x32xf32>
    %28 = arith.addf %21, %27 : vector<8x32xf32>
    %c0_24 = arith.constant 0 : index
    %c0_25 = arith.constant 0 : index
    %29 = vector.load %arg3[%c0_24, %c0_25] : memref<1x32xf32, #tpu.memory_space<vmem>>, vector<1x32xf32>
    %30 = vector.broadcast %29 : vector<1x32xf32> to vector<8x32xf32>
    %31 = arith.addf %28, %30 : vector<8x32xf32>
    %32 = arith.mulf %31, %31 : vector<8x32xf32>
    %33 = arith.mulf %31, %32 : vector<8x32xf32>
    %cst_26 = arith.constant 4.471500e-02 : f32
    %34 = vector.broadcast %cst_26 : f32 to vector<8x32xf32>
    %35 = arith.mulf %34, %33 : vector<8x32xf32>
    %36 = arith.addf %31, %35 : vector<8x32xf32>
    %cst_27 = arith.constant 0.797884583 : f32
    %37 = vector.broadcast %cst_27 : f32 to vector<8x32xf32>
    %38 = arith.mulf %37, %36 : vector<8x32xf32>
    %39 = math.tanh %38 : vector<8x32xf32>
    %cst_28 = arith.constant 1.000000e+00 : f32
    %40 = vector.broadcast %cst_28 : f32 to vector<8x32xf32>
    %41 = arith.addf %40, %39 : vector<8x32xf32>
    %cst_29 = arith.constant 5.000000e-01 : f32
    %42 = vector.broadcast %cst_29 : f32 to vector<8x32xf32>
    %43 = arith.mulf %42, %41 : vector<8x32xf32>
    %44 = arith.mulf %31, %43 : vector<8x32xf32>
    %c0_30 = arith.constant 0 : index
    %c2_31 = arith.constant 2 : index
    %c0_32 = arith.constant 0 : index
    %45 = vector.load %arg1[%c0_30, %c2_31, %c0_32] : memref<1x12x32xf32, #tpu.memory_space<vmem>>, vector<1x8x32xf32>
    %46 = vector.shape_cast %45 : vector<1x8x32xf32> to vector<8x32xf32>
    %47 = arith.addf %46, %44 : vector<8x32xf32>
    %c0_33 = arith.constant 0 : index
    %c0_34 = arith.constant 0 : index
    %c0_35 = arith.constant 0 : index
    %48 = vector.load %arg4[%c0_33, %c0_34, %c0_35] : memref<1x8x32xf32, #tpu.memory_space<vmem>>, vector<1x8x32xf32>
    %49 = vector.shape_cast %48 : vector<1x8x32xf32> to vector<8x32xf32>
    %50 = vector.shape_cast %47 : vector<8x32xf32> to vector<1x8x32xf32>
    tpu.vector_store %arg4[%c0_33, %c0_34, %c0_35], %50 {strides = array<i32>} : memref<1x8x32xf32, #tpu.memory_space<vmem>>, vector<1x8x32xf32>,
    return
  }
  func.func @transform_0(%arg0: i32) -> (i32, i32, i32) {
    %c0_i32 = arith.constant 0 : i32
    %c0_i32_0 = arith.constant 0 : i32
    %c0_i32_1 = arith.constant 0 : i32
    return %arg0, %c0_i32, %c0_i32_0 : i32, i32, i32
  }
  func.func @transform_1(%arg0: i32) -> (i32, i32, i32) {
    %c0_i32 = arith.constant 0 : i32
    %c0_i32_0 = arith.constant 0 : i32
    %c0_i32_1 = arith.constant 0 : i32
    %c0_i32_2 = arith.constant 0 : i32
    return %c0_i32, %c0_i32_0, %c0_i32_1 : i32, i32, i32
  }
  func.func @transform_2(%arg0: i32) -> (i32, i32) {
    %c0_i32 = arith.constant 0 : i32
    %c0_i32_0 = arith.constant 0 : i32
    %c0_i32_1 = arith.constant 0 : i32
    return %c0_i32, %c0_i32_0 : i32, i32
  }
  func.func @transform_3(%arg0: i32) -> (i32, i32, i32) {
    %c0_i32 = arith.constant 0 : i32
    %c0_i32_0 = arith.constant 0 : i32
    %c0_i32_1 = arith.constant 0 : i32
    return %arg0, %c0_i32, %c0_i32_0 : i32, i32, i32
  }
}

</mosaic_0001>

<bundles_post_ra>
// kernel: tpu_custom_call.1
= control target key start
LH: loop header
LB: loop body
LE: loop exit
PB: predicated region body
PF: predicated region fallthrough
CT: control target
= control target key end

     0   :  { %8 = vsyncpa [#allocation3], 0  ;;  %s909_s0 = inlined_call_operand.vmem [shape: f32[2,12,32], index: 0, kind: input, shape index: {}]   ;;  %s910_s1 = inlined_call_operand.hbm [shape: bf16[4,32,32], index: 1, kind: input, shape index: {}]   ;;  %s911_s2 = inlined_call_operand.vmem [shape: f32[1,32], index: 2, kind: input, shape index: {}]   ;;  %s912_s3 = inlined_call_operand.hbm [shape: f32[2,8,32], index: 3, kind: output, shape index: {}]  }
   0x1   :  { %9 = vsyncpa [#allocation4], 0 }
   0x2   :  { %11 = vsyncpa [#allocation4 + $0x1], 0  ;;  %s792_s12 = smov 0   ;;  %s794_s13 = smov 0  }
   0x3   :  { %s796_s14 = smov 0   ;;  %s798_s15 = smov 0  }
   0x4 LB: > { %s813_s16 = sadd.s32 4294967295, %s764_s15   ;;  %s539_s17 = sadd.s32 4294967294, %s764_s15   ;;  %s764_s15 = sphi %s798_s15, %s920_s15   ;;  %s760_s14 = sphi %s796_s14, %s919_s14   ;;  %s756_s13 = sphi %s794_s13, %s918_s13   ;;  %s752_s12 = sphi %s792_s12, %s917_s12  }
   0x5   : > { %s817_s18 = sadd.s32 1, %s764_s15   ;;  %s92_s19 = sadd.s32 1, %s760_s14 }
   0x6   : > { %s89_s20 = ssub.s32 %s764_s15, %s817_s18  ;;  %p102_p0 = scmp.ne.s32.totalorder %s760_s14, %s756_s13 }
   0x7   : > { %p90_p1 = scmp.eq.s32.totalorder %s89_s20, 0  ;;  %p103_p2 = scmp.eq.s32.totalorder %s813_s16, 1 }
   0x8   : > { %p108_p3 = scmp.ne.s32.totalorder %s756_s13, %s752_s12  ;;  %p109_p4 = scmp.eq.s32.totalorder %s539_s17, 1 }
   0x9   : > { %s828_s21 = scalar_select %p90_p1, %s760_s14, %s92_s19  }
   0xa   : > { %p830_p5 = por %p103_p2, %p102_p0  ;;  %p834_p6 = por %p109_p4, %p108_p3 }
   0xb   : > { %p540_p7 = scmp.ge.s32.totalorder %s764_s15, 1  ;;  %p116_p8 = scmp.lt.s32.totalorder %s764_s15, 3 }
   0xc   : > { %s914_s23 = scalar_select %p834_p6, 1, 0 }
   0xd   : > { %p624_p9 = scmp.eq.s32.totalorder %s813_s16, 0  ;;  %p841_p10 = pnand %p540_p7, %p116_p8 }
   0xe   : > { %s766_s25 = smov [#allocation2]  }
   0xf   : > { %s128_s26 = sshll.u32 %s766_s25, 4  ;;  %p616_p11 = pneg %p841_p10  ;;  %s129_s26 = int_to_ptr.vmem [resolvable:$true] %s128_s26 }
  0x10   : > { %s685_s27 = scalar_lea.vmem %s129_s26, 1024  ;;  %p693_p3 = scmp.lt.s32.totalorder %s129_s26, %s129_s26 }
  0x11   : > { %p617_p12 = pnand %p624_p9, %p616_p11  ;;  %p686_p0 = scmp.ne.s32.totalorder %s129_s26, %s685_s27 }
  0x12   : > { %p694_p4 = scmp.lt.s32.totalorder %s685_s27, %s685_s27 }
  0x13   : > { %p676_p13 = pneg %p617_p12 }
  0x14   : > { %p695_p6 = por %p694_p4, %p693_p3 }
  0x15   : > { %p688_p1 = pnand %p686_p0, %p676_p13 }
  0x17   : > { %p689_p2 = pneg %p688_p1 }
  0x19   : > { %p696_p7 = pnand %p695_p6, %p689_p2 }
  0x1b   : > { %699 = shalt.err (!%p696_p7)
}
  0x1c   : > { %s767_s28 = smov 64   ;;  %s768_s29 = smov 4  }
  0x1d   : > { %619 = dma.hbm_to_vmem [thread:$0]  (!%p617_p12), %s910_s1, 1024, %s129_s26, [#allocation3], %s767_s28, %s767_s28, %s768_s29  }
  0x1e   : > { %155 = sbr.rel (%p841_p10) target bundleno = 298 (0x12a), region = 32 }
  0x23   : > { %743 = dma.done.wait (%p624_p9), [#allocation3], 1024  }
  0x24   : > { %745 = vsyncadd (%p624_p9), [#allocation3], 4294966272  ;;  %p179_p8 = scmp.lt.s32.totalorder %s813_s16, 1  ;;  %v769_v0 = vmov 0.0   ;;  %vm770_vm0 = vmmov 0   ;;  %v664_v1 = vld [vmem:[#allocation2 + $0x18] sm:$0xff]  }
  0x25   : > { %578 = vmatprep.subr.bf16.mxu0 %v769_v0  ;;  %586 = vmatprep.subr.bf16.mxu1 %v769_v0  ;;  %v665_v2 = vld [vmem:[#allocation2 + $0x8] sm:$0xff]   ;;  %v666_v3 = vld [vmem:[#allocation2 + $0x10] sm:$0xff]   ;;  %v667_v4 = vld [vmem:[#allocation2] sm:$0xff]   ;;  %vm210_vm1 = vcmask 261120   ;;  %s176_s17 = sand.u32 1, %s756_s13   ;;  %s562_s20 = sshll.u32 %s813_s16, 7 }
  0x26   : > { %582 = vmatprep.mubr.msk.bf16.mxu0 %vm770_vm0, %v769_v0  ;;  %590 = vmatprep.mubr.msk.bf16.mxu1 %vm770_vm0, %v769_v0  ;;  %s180_s5 = scalar_select %p179_p8, %s813_s16, 1  ;;  %v668_v9 = vld [vmem:[#allocation2 + $0x28] sm:$0xff]   ;;  %v669_v10 = vld [vmem:[#allocation2 + $0x38] sm:$0xff]   ;;  %v670_v11 = vld [vmem:[#allocation2 + $0x20] sm:$0xff]  }
  0x27   : > { %579 = vmatpush3.bf16.msra.mxu0 %v664_v1  ;;  %587 = vmatpush3.bf16.msra.mxu1 %v665_v2  ;;  %v671_v13 = vld [vmem:[#allocation2 + $0x30] sm:$0xff]   ;;  %v560_v29 = vld [vmem:[%s911_s2] ss:$0 sm:$0xff]  ;;  %s545_s19 = sshll.u32 %s176_s17, 3  ;;  %s466_s28 = scalar_lea.hbm %s912_s3, %s562_s20 }
  0x28   : > { %s565_s6 = sshll.u32 %s180_s5, 4  ;;  %580 = vmatprep.subr.bf16.mxu0 %v769_v0  ;;  %588 = vmatprep.subr.bf16.mxu1 %v769_v0  ;;  %s178_s24 = scalar_lea.vmem [#allocation5], %s545_s19 }
  0x29   : > { %s183_s9 = scalar_lea.vmem %s909_s0, %s565_s6  ;;  %s468_s25 = sshll.u32 %s178_s24, 4  ;;  %s469_s25 = int_to_ptr.vmem [resolvable:$true] %s468_s25 }
  0x2a   : > { %v191_v5 = vld [vmem:[%s183_s9 + $0x1] sm:$0xff]  ;;  %s455_s29 = scalar_lea.sflag [#allocation4], %s176_s17  ;;  %s700_s30 = scalar_lea.vmem %s469_s25, 128 }
  0x2b   : > { %v185_v6 = vld [vmem:[%s183_s9] sm:$0xff]  ;;  %v192_v7 = vpack.c.bf16 %v191_v5, %v191_v5  ;;  %581 = vmatpush3.bf16.msra.mxu0 %v666_v3  ;;  %589 = vmatpush3.bf16.msra.mxu1 %v667_v4  ;;  %p701_p6 = scmp.ne.s32.totalorder %s469_s25, %s700_s30  ;;  %s771_s4 = smov [#allocation5]  }
  0x2c   : > { %v186_v8 = vpack.c.bf16 %v185_v6, %v185_v6  ;;  %594 = vmatprep.subr.bf16.mxu0 %v769_v0  ;;  %602 = vmatprep.subr.bf16.mxu1 %v769_v0  ;;  %v309_v12 = vld [vmem:[%s183_s9 + $0x2] sm:$0xff]  ;;  %s704_s5 = sshll.u32 %s771_s4, 4  ;;  %s705_s5 = int_to_ptr.vmem [resolvable:$false] %s704_s5 }
  0x2d   : > { %v372_v14 = vld [vmem:[%s183_s9 + $0x3] sm:$0xff]  ;;  %v310_v15 = vpack.c.bf16 %v309_v12, %v309_v12  ;;  %p702_p9 = pnand %p701_p6, %p830_p5  ;;  %s706_s16 = scalar_lea.vmem %s705_s5, 256 }
  0x2e   : > { %583 = vmatmul.mubr.msk.bf16.vlgmr.msra.gmra.mxu0 %vm210_vm1, %v192_v7  ;;  %591 = vmatmul.mubr.msk.bf16.vlgmr.msra.gmra.mxu1 %vm210_vm1, %v186_v8  ;;  %v373_v16 = vpack.c.bf16 %v372_v14, %v372_v14  ;;  %p707_p11 = scmp.lt.s32.totalorder %s469_s25, %s705_s5  ;;  %p708_p12 = scmp.lt.s32.totalorder %s706_s16, %s700_s30 }
  0x2f   : > { %595 = vmatpush3.bf16.msra.mxu0 %v668_v9  ;;  %603 = vmatpush3.bf16.msra.mxu1 %v669_v10  ;;  %p703_p10 = pneg %p702_p9 }
  0x30   : > { %596 = vmatprep.subr.bf16.mxu0 %v769_v0  ;;  %604 = vmatprep.subr.bf16.mxu1 %v769_v0  ;;  %p709_p13 = por %p708_p12, %p707_p11 }
  0x31   : > { %598 = vmatprep.mubr.msk.bf16.mxu0 %vm770_vm0, %v769_v0  ;;  %606 = vmatprep.mubr.msk.bf16.mxu1 %vm770_vm0, %v769_v0 }
  0x32   : > { %p710_p0 = pnand %p709_p13, %p703_p10 }
  0x33   : > { %597 = vmatpush3.bf16.msra.mxu0 %v670_v11  ;;  %605 = vmatpush3.bf16.msra.mxu1 %v671_v13 }
  0x36   : > { %599 = vmatmul.mubr.msk.bf16.vlgmr.msra.gmra.mxu0 %vm210_vm1, %v310_v15  ;;  %607 = vmatmul.mubr.msk.bf16.vlgmr.msra.gmra.mxu1 %vm210_vm1, %v373_v16 }
  0xee   : > { %v248_v17 = vpop.f32.mrf.mxu0  ;;  %v303_v18 = vpop.f32.mrf.mxu1 }
  0xef   : > { %v304_v24 = vadd.f32 %v303_v18, %v248_v17 }
  0xf0   : > { %v584_v19 = vpop.f32.mrf.mxu0  ;;  %v592_v20 = vpop.f32.mrf.mxu1 }
  0xf2   : > { %v251_v21 = vpop.f32.mrf.mxu0  ;;  %v306_v22 = vpop.f32.mrf.mxu1 }
  0xf4   : > { %v585_v23 = vpop.f32.mrf.mxu0  ;;  %v593_v25 = vpop.f32.mrf.mxu1 }
  0xf6   : > { %v365_v26 = vpop.f32.mrf.mxu0  ;;  %v428_v28 = vpop.f32.mrf.mxu1 }
  0xf7   : > { %v371_v27 = vadd.f32 %v365_v26, %v304_v24 }
  0xf8   : > { %v600_v30 = vpop.f32.mrf.mxu0  ;;  %v608_v32 = vpop.f32.mrf.mxu1 }
  0xf9   : > { %v434_v31 = vadd.f32 %v428_v28, %v371_v27 }
  0xfa   : > { %v368_v33 = vpop.f32.mrf.mxu0  ;;  %v431_v35 = vpop.f32.mrf.mxu1 }
  0xfb   : > { %v442_v34 = vadd.f32 %v560_v29, %v434_v31 }
  0xfc   : > { %v601_v36 = vpop.f32.mrf.mxu0  ;;  %v609_v38 = vpop.f32.mrf.mxu1 }
  0xfd   : > { %v443_v37 = vmul.f32 %v442_v34, %v442_v34 }
  0xff   : > { %v444_v39 = vmul.f32 %v443_v37, %v442_v34 }
 0x101   : > { %v445_v40 = vmul.f32 0.044715, %v444_v39 }
 0x103   : > { %v446_v41 = vadd.f32 %v445_v40, %v442_v34 }
 0x105   : > { %v447_v42 = vmul.f32 0.7978846, %v446_v41 }
 0x107   : > { %672 = vtanh.f32 %v447_v42 }
 0x114   : > { %v673_v43 = vpop.eup %672 }
 0x115   : > { %v449_v44 = vadd.f32 1.0, %v673_v43 }
 0x117   : > { %v450_v45 = vmul.f32 0.5, %v449_v44 }
 0x119   : > { %v451_v46 = vmul.f32 %v450_v45, %v442_v34 }
 0x11b   : > { %v452_v47 = vadd.f32 %v451_v46, %v309_v12 }
 0x11d   : > { %453 = vst.msk [vmem:[%s178_s24] sm:$0xff] %vm210_vm1, %v452_v47 }
 0x11e   : > { %713 = shalt.err (!%p710_p0)
}
 0x11f   : > { %s714_s6 = scalar_lea.hbm %s466_s28, 128  ;;  %s718_s9 = scalar_lea.hbm %s912_s3, 256 }
 0x120   : > { %p715_p1 = scmp.ne.s32.totalorder %s466_s28, %s714_s6  ;;  %p719_p4 = scmp.lt.s32.totalorder %s466_s28, %s912_s3 }
 0x121   : > { %p720_p7 = scmp.lt.s32.totalorder %s718_s9, %s714_s6 }
 0x122   : > { %p716_p2 = pnand %p715_p1, %p830_p5 }
 0x123   : > { %p721_p8 = por %p720_p7, %p719_p4 }
 0x124   : > { %p717_p3 = pneg %p716_p2 }
 0x126   : > { %p722_p6 = pnand %p721_p8, %p717_p3 }
 0x128   : > { %725 = shalt.err (!%p722_p6)
}
 0x129   : > { %614 = dma.vmem_to_hbm [thread:$0]  (%p830_p5), %s469_s25, 128, %s466_s28, %s455_s29  }
 0x12a PF: > { %p626_p9 = scmp.ge.s32.totalorder %s764_s15, 2  ;;  %s480_s17 = sand.u32 1, %s752_s12  }
 0x12b   : > { %p916_p10 = scmp.ne.s32.totalorder %s914_s23, 0  ;;  %s481_s19 = scalar_lea.sflag [#allocation4], %s480_s17 }
 0x12d   : > { %p621_p11 = pnand %p626_p9, %p916_p10 }
 0x12f   : > { %p622_p12 = pneg %p621_p11 }
 0x131   : > { %747 = dma.done.wait (%p622_p12), %s481_s19, 128  }
 0x132   : > { %749 = vsyncadd (%p622_p12), %s481_s19, 4294967168  ;;  %p14_p13 = scmp.ge.s32.totalorder %s817_s18, 4   ;;  %s917_s12 = smov %s756_s13 }
 0x133   : > { %s918_s13 = smov %s760_s14  ;;  %s919_s14 = smov %s828_s21 }
 0x134   : > { %s920_s15 = smov %s817_s18  ;;  %16 = sbr.rel (!%p14_p13) target bundleno = 4 (0x4), region = 75 }
 0x139   :  { %486 = vsyncpa [#allocation3], 1 }
 0x13a   :  { %488 = vsyncpa [#allocation3 + $0x1], 1 }
 0x13b   :  { %489 = vsyncpa [#allocation4], 1 }
 0x13c   :  { %491 = vsyncpa [#allocation4 + $0x1], 1 }

</bundles_post_ra>
